<compile_context>
chip_gen: v6e
topology: v6e:2x2x1
jax: 0.10.0
libtpu: 0.0.40
codegen_flags: <defaults>
</compile_context>

<pallas_src>
import functools

import jax
import jax.numpy as jnp
from jax.experimental import pallas as pl
from jax.experimental.pallas import tpu as pltpu


# ---------------------------------------------------------------------------
# Kernel
# ---------------------------------------------------------------------------
def scorenet_kernel(
    x_ref,                 # (tb, data_dim) batch tile
    wf_ref, bf_ref,        # fused net1 + net2[0]: (data_dim, H) f32, (1, H) f32
    w2b_ref, b2b_ref,      # net2[2]
    w2c_ref, b2c_ref,      # net2[4]
    w2d_ref, b2d_ref,      # net2[6]
    w3_ref, b3_ref,        # net3, zero-padded to a lane-dense column count
    out_ref,               # (tb, out_pad)
):
    wdt = w2b_ref.dtype
    x = x_ref[...].astype(jnp.float32)      # (tb, data_dim)
    wf = wf_ref[...]                        # (data_dim, H), kept f32
    data_dim = wf.shape[0]

    # --- Fused net1 + net2[0]: Linear -> ReLU.
    if data_dim <= 8:
        # K=data_dim is far too small to feed the MXU; do a VPU outer product.
        h = bf_ref[...]                     # (1, H), broadcasts up
        for d in range(data_dim):           # static, tiny loop
            h = h + x[:, d:d + 1] * wf[d:d + 1, :]
    else:
        h = jnp.dot(x, wf, preferred_element_type=jnp.float32) + bf_ref[...]
    h = jnp.maximum(h, 0.0)

    # --- Remaining hidden layers: Linear -> ReLU (f32 accumulation on the MXU).
    h = jnp.dot(h.astype(wdt), w2b_ref[...], preferred_element_type=jnp.float32)
    h = jnp.maximum(h + b2b_ref[...], 0.0)
    h = jnp.dot(h.astype(wdt), w2c_ref[...], preferred_element_type=jnp.float32)
    h = jnp.maximum(h + b2c_ref[...], 0.0)
    h = jnp.dot(h.astype(wdt), w2d_ref[...], preferred_element_type=jnp.float32)
    h = jnp.maximum(h + b2d_ref[...], 0.0)

    # --- net3: Linear(H -> padded data_dim); lane-dense (>=128 wide) store.
    out = jnp.dot(h.astype(wdt), w3_ref[...], preferred_element_type=jnp.float32)
    out_ref[...] = (out + b3_ref[...]).astype(out_ref.dtype)


# ---------------------------------------------------------------------------
# One-time parameter prep (hoisted out of the per-call forward path)
# ---------------------------------------------------------------------------
def _default_weight_dtype():
    """bf16 weights on v6e/v7x (native bf16, halves weight DMA); f32 on v5e."""
    try:
        kind = jax.devices()[0].device_kind.lower()
    except Exception:  # pragma: no cover
        return jnp.float32
    if "v6" in kind or "v7" in kind:
        return jnp.bfloat16
    return jnp.float32


def prepare_params(params, weight_dtype=None):
    """Fold net1 (no activation) into the first hidden Linear, pad net3 to a
    lane-dense column count, and cast weights.  Run ONCE, not per forward."""
    if weight_dtype is None:
        weight_dtype = _default_weight_dtype()
    (w1, b1, w2a, b2a, w2b, b2b, w2c, b2c, w2d, b2d, w3, b3) = params
    H = w1.shape[1]
    out_dim = w3.shape[1]

    # Algebraic fold (done in f32 regardless of weight_dtype).
    wf = w1.astype(jnp.float32) @ w2a.astype(jnp.float32)          # (data_dim, H)
    bf = b1.astype(jnp.float32) @ w2a.astype(jnp.float32) + b2a    # (1, H)

    # Lane-dense output: zero-pad the last projection to exactly 128 cols
    # (or the next multiple of 128 for larger data_dim).
    out_pad = max(128, -(-out_dim // 128) * 128)
    w3p = jnp.zeros((H, out_pad), jnp.float32).at[:, :out_dim].set(w3)
    b3p = jnp.zeros((1, out_pad), jnp.float32).at[:, :out_dim].set(b3)

    wd = jnp.dtype(weight_dtype)
    return (
        wf.astype(jnp.float32), bf.astype(jnp.float32),   # tiny; stays f32 for the VPU path
        w2b.astype(wd), b2b.astype(jnp.float32),
        w2c.astype(wd), b2c.astype(jnp.float32),
        w2d.astype(wd), b2d.astype(jnp.float32),
        w3p.astype(wd), b3p.astype(jnp.float32),
    )


# ---------------------------------------------------------------------------
# Forward wrapper
# ---------------------------------------------------------------------------
@functools.partial(
    jax.jit, static_argnames=("block_b", "target_grid_steps", "return_padded"))
def scorenet_forward(x, prepped, *, block_b=512, target_grid_steps=2,
                     return_padded=False):
    """x: (B, data_dim) float32; prepped: output of prepare_params()."""
    wf, bf, w2b, b2b, w2c, b2c, w2d, b2d, w3p, b3p = prepped
    B, data_dim = x.shape
    H = wf.shape[1]
    out_pad = w3p.shape[1]

    # Batch tiling: aim for `target_grid_steps` grid steps (>=2 keeps both
    # TensorCores busy on v7x; the extra step is near-free on v5e/v6e), with an
    # upper tile cap of block_b and 8-row alignment.
    tb = -(-B // max(1, target_grid_steps))
    tb = max(8, -(-tb // 8) * 8)
    tb = min(tb, block_b)
    B_pad = -(-B // tb) * tb
    xp = jnp.pad(x, ((0, B_pad - B), (0, 0))) if B_pad != B else x
    grid = (B_pad // tb,)

    weight_args = [wf, bf, w2b, b2b, w2c, b2c, w2d, b2d, w3p, b3p]

    # Weights/biases: constant index_map -> DMA'd once, stay VMEM-resident.
    def const_spec(a):
        return pl.BlockSpec(a.shape, lambda i: (0, 0))

    in_specs = [pl.BlockSpec((tb, data_dim), lambda i: (i, 0))]
    in_specs += [const_spec(a) for a in weight_args]
    out_specs = pl.BlockSpec((tb, out_pad), lambda i: (i, 0))

    # VMEM budget: weights (x2 buffers), double-buffered I/O tiles, activations,
    # plus fixed headroom.  (No extra global x2 -- the old formula over-reserved.)
    nbytes = lambda a: a.size * a.dtype.itemsize
    weight_bytes = sum(nbytes(a) for a in weight_args)
    io_bytes = 2 * (tb * data_dim * x.dtype.itemsize + tb * out_pad * 4)
    act_bytes = 4 * tb * H * 4
    vmem_bytes = int(2 * weight_bytes + io_bytes + act_bytes) + (8 << 20)

    flops = 2 * B_pad * (data_dim * H + 3 * H * H + H * out_pad)
    bytes_accessed = int(B_pad * data_dim * x.dtype.itemsize
                         + weight_bytes
                         + B_pad * out_pad * x.dtype.itemsize)

    out = pl.pallas_call(
        scorenet_kernel,
        out_shape=jax.ShapeDtypeStruct((B_pad, out_pad), x.dtype),
        grid=grid,
        in_specs=in_specs,
        out_specs=out_specs,
        compiler_params=pltpu.CompilerParams(
            dimension_semantics=("parallel",),
            vmem_limit_bytes=vmem_bytes,
        ),
        cost_estimate=pl.CostEstimate(
            flops=flops, transcendentals=0, bytes_accessed=bytes_accessed),
    )(xp, *weight_args)

    if return_padded:
        # Consumer takes the padded slab; rows >= B and cols >= data_dim are
        # padding garbage and must be masked/ignored downstream.
        return out
    return out[:B, :data_dim]


# ---------------------------------------------------------------------------
# Init + pure-JAX reference (mirrors the PyTorch forward exactly)
# ---------------------------------------------------------------------------
def init_params(key, data_dim, hidden_dim):
    """Deterministic init mimicking PyTorch's default Linear init
    (uniform(-1/sqrt(fan_in), 1/sqrt(fan_in))). Weights stored (in, out)."""
    def linear(key, fan_in, fan_out):
        kw, kb = jax.random.split(key)
        bound = 1.0 / jnp.sqrt(fan_in)
        W = jax.random.uniform(kw, (fan_in, fan_out), jnp.float32, -bound, bound)
        b = jax.random.uniform(kb, (1, fan_out), jnp.float32, -bound, bound)
        return W, b

    keys = jax.random.split(key, 6)
    params = []
    params += list(linear(keys[0], data_dim, hidden_dim))    # net1
    params += list(linear(keys[1], hidden_dim, hidden_dim))  # net2[0]
    params += list(linear(keys[2], hidden_dim, hidden_dim))  # net2[2]
    params += list(linear(keys[3], hidden_dim, hidden_dim))  # net2[4]
    params += list(linear(keys[4], hidden_dim, hidden_dim))  # net2[6]
    params += list(linear(keys[5], hidden_dim, data_dim))    # net3
    return params


def scorenet_reference(x, params):
    (w1, b1, w2a, b2a, w2b, b2b, w2c, b2c, w2d, b2d, w3, b3) = params
    h = x @ w1 + b1
    h = jnp.maximum(h @ w2a + b2a, 0.0)
    h = jnp.maximum(h @ w2b + b2b, 0.0)
    h = jnp.maximum(h @ w2c + b2c, 0.0)
    h = jnp.maximum(h @ w2d + b2d, 0.0)
    return h @ w3 + b3


if __name__ == "__main__":
    data_dim = 2
    hidden_dim = 128   # PyTorch module default
    batch = 256        # -> 2 grid steps of 128-row tiles (both TCs busy on v7x)

    key = jax.random.PRNGKey(0)
    kx, kp = jax.random.split(key)
    x = jax.random.normal(kx, (batch, data_dim), dtype=jnp.float32)
    params = init_params(kp, data_dim, hidden_dim)
    ref = scorenet_reference(x, params)

    # f32 weights: tight check against the unfused reference.
    prepped_f32 = prepare_params(params, weight_dtype=jnp.float32)
    out = jax.block_until_ready(scorenet_forward(x, prepped_f32))
    assert out.shape == (batch, data_dim)
    assert jnp.allclose(out, ref, atol=1e-4, rtol=1e-4), float(
        jnp.max(jnp.abs(out - ref)))

    # Auto weight dtype (bf16 on v6e/v7x, f32 on v5e): sanity check, loose tol.
    prepped_auto = prepare_params(params)
    out2 = jax.block_until_ready(scorenet_forward(x, prepped_auto))
    assert out2.shape == (batch, data_dim)
    assert jnp.allclose(out2, ref, atol=2e-1, rtol=2e-1), float(
        jnp.max(jnp.abs(out2 - ref)))

    print("KERNEL_OK")
</pallas_src>

<mosaic_0001>
module attributes {stable_mosaic.version = 11 : i64} {
  func.func @scorenet_kernel(%arg0: i32, %arg1: memref<128x2xf32, #tpu.memory_space<vmem>>, %arg2: memref<2x128xf32, #tpu.memory_space<vmem>>, %arg3: memref<1x128xf32, #tpu.memory_space<vmem>>, %arg4: memref<128x128xf32, #tpu.memory_space<vmem>>, %arg5: memref<1x128xf32, #tpu.memory_space<vmem>>, %arg6: memref<128x128xf32, #tpu.memory_space<vmem>>, %arg7: memref<1x128xf32, #tpu.memory_space<vmem>>, %arg8: memref<128x128xf32, #tpu.memory_space<vmem>>, %arg9: memref<1x128xf32, #tpu.memory_space<vmem>>, %arg10: memref<128x128xf32, #tpu.memory_space<vmem>>, %arg11: memref<1x128xf32, #tpu.memory_space<vmem>>, %arg12: memref<128x128xf32, #tpu.memory_space<vmem>>) attributes {dimension_semantics = [#tpu.dimension_semantics<parallel>], iteration_bounds = array<i64: 2>, scalar_prefetch = 0 : i64, scratch_operands = 0 : i64, tpu.core_type = #tpu.core_type<tc>, window_params = [{transform_indices = @transform_0, window_bounds = array<i64: 128, 2>}, {pipeline_mode = #tpu.pipeline_mode<synchronous>, transform_indices = @transform_1, window_bounds = array<i64: 2, 128>}, {pipeline_mode = #tpu.pipeline_mode<synchronous>, transform_indices = @transform_2, window_bounds = array<i64: 1, 128>}, {pipeline_mode = #tpu.pipeline_mode<synchronous>, transform_indices = @transform_3, window_bounds = array<i64: 128, 128>}, {pipeline_mode = #tpu.pipeline_mode<synchronous>, transform_indices = @transform_4, window_bounds = array<i64: 1, 128>}, {pipeline_mode = #tpu.pipeline_mode<synchronous>, transform_indices = @transform_5, window_bounds = array<i64: 128, 128>}, {pipeline_mode = #tpu.pipeline_mode<synchronous>, transform_indices = @transform_6, window_bounds = array<i64: 1, 128>}, {pipeline_mode = #tpu.pipeline_mode<synchronous>, transform_indices = @transform_7, window_bounds = array<i64: 128, 128>}, {pipeline_mode = #tpu.pipeline_mode<synchronous>, transform_indices = @transform_8, window_bounds = array<i64: 1, 128>}, {pipeline_mode = #tpu.pipeline_mode<synchronous>, transform_indices = @transform_9, window_bounds = array<i64: 128, 128>}, {pipeline_mode = #tpu.pipeline_mode<synchronous>, transform_indices = @transform_10, window_bounds = array<i64: 1, 128>}, {transform_indices = @transform_11, window_bounds = array<i64: 128, 128>}]} {
    %c0 = arith.constant 0 : index
    %c0_0 = arith.constant 0 : index
    %0 = vector.load %arg1[%c0, %c0_0] : memref<128x2xf32, #tpu.memory_space<vmem>>, vector<128x2xf32>
    %c0_1 = arith.constant 0 : index
    %c0_2 = arith.constant 0 : index
    %1 = vector.load %arg2[%c0_1, %c0_2] : memref<2x128xf32, #tpu.memory_space<vmem>>, vector<2x128xf32>
    %c0_3 = arith.constant 0 : index
    %c0_4 = arith.constant 0 : index
    %2 = vector.load %arg3[%c0_3, %c0_4] : memref<1x128xf32, #tpu.memory_space<vmem>>, vector<1x128xf32>
    %3 = vector.extract_strided_slice %0 {offsets = [0, 0], sizes = [128, 1], strides = [1, 1]} : vector<128x2xf32> to vector<128x1xf32>
    %4 = vector.extract_strided_slice %1 {offsets = [0, 0], sizes = [1, 128], strides = [1, 1]} : vector<2x128xf32> to vector<1x128xf32>
    %5 = vector.broadcast %3 : vector<128x1xf32> to vector<128x128xf32>
    %6 = vector.broadcast %4 : vector<1x128xf32> to vector<128x128xf32>
    %7 = arith.mulf %5, %6 : vector<128x128xf32>
    %8 = vector.broadcast %2 : vector<1x128xf32> to vector<128x128xf32>
    %9 = arith.addf %8, %7 : vector<128x128xf32>
    %10 = vector.extract_strided_slice %0 {offsets = [0, 1], sizes = [128, 1], strides = [1, 1]} : vector<128x2xf32> to vector<128x1xf32>
    %11 = vector.extract_strided_slice %1 {offsets = [1, 0], sizes = [1, 128], strides = [1, 1]} : vector<2x128xf32> to vector<1x128xf32>
    %12 = vector.broadcast %10 : vector<128x1xf32> to vector<128x128xf32>
    %13 = vector.broadcast %11 : vector<1x128xf32> to vector<128x128xf32>
    %14 = arith.mulf %12, %13 : vector<128x128xf32>
    %15 = arith.addf %9, %14 : vector<128x128xf32>
    %cst = arith.constant 0.000000e+00 : f32
    %16 = vector.broadcast %cst : f32 to vector<128x128xf32>
    %17 = arith.maximumf %15, %16 : vector<128x128xf32>
    %c0_5 = arith.constant 0 : index
    %c0_6 = arith.constant 0 : index
    %18 = vector.load %arg4[%c0_5, %c0_6] : memref<128x128xf32, #tpu.memory_space<vmem>>, vector<128x128xf32>
    %cst_7 = arith.constant dense<0.000000e+00> : vector<128x128xf32>
    %19 = tpu.matmul %17, %18, %cst_7 {dimension_numbers = #tpu.dot_dimension_numbers<[1], [0], [0], [1], [0, 0, 1, 1], [], []>} : vector<128x128xf32>, vector<128x128xf32>, vector<128x128xf32> -> vector<128x128xf32>
    %c0_8 = arith.constant 0 : index
    %c0_9 = arith.constant 0 : index
    %20 = vector.load %arg5[%c0_8, %c0_9] : memref<1x128xf32, #tpu.memory_space<vmem>>, vector<1x128xf32>
    %21 = vector.broadcast %20 : vector<1x128xf32> to vector<128x128xf32>
    %22 = arith.addf %19, %21 : vector<128x128xf32>
    %cst_10 = arith.constant 0.000000e+00 : f32
    %23 = vector.broadcast %cst_10 : f32 to vector<128x128xf32>
    %24 = arith.maximumf %22, %23 : vector<128x128xf32>
    %c0_11 = arith.constant 0 : index
    %c0_12 = arith.constant 0 : index
    %25 = vector.load %arg6[%c0_11, %c0_12] : memref<128x128xf32, #tpu.memory_space<vmem>>, vector<128x128xf32>
    %cst_13 = arith.constant dense<0.000000e+00> : vector<128x128xf32>
    %26 = tpu.matmul %24, %25, %cst_13 {dimension_numbers = #tpu.dot_dimension_numbers<[1], [0], [0], [1], [0, 0, 1, 1], [], []>} : vector<128x128xf32>, vector<128x128xf32>, vector<128x128xf32> -> vector<128x128xf32>
    %c0_14 = arith.constant 0 : index
    %c0_15 = arith.constant 0 : index
    %27 = vector.load %arg7[%c0_14, %c0_15] : memref<1x128xf32, #tpu.memory_space<vmem>>, vector<1x128xf32>
    %28 = vector.broadcast %27 : vector<1x128xf32> to vector<128x128xf32>
    %29 = arith.addf %26, %28 : vector<128x128xf32>
    %cst_16 = arith.constant 0.000000e+00 : f32
    %30 = vector.broadcast %cst_16 : f32 to vector<128x128xf32>
    %31 = arith.maximumf %29, %30 : vector<128x128xf32>
    %c0_17 = arith.constant 0 : index
    %c0_18 = arith.constant 0 : index
    %32 = vector.load %arg8[%c0_17, %c0_18] : memref<128x128xf32, #tpu.memory_space<vmem>>, vector<128x128xf32>
    %cst_19 = arith.constant dense<0.000000e+00> : vector<128x128xf32>
    %33 = tpu.matmul %31, %32, %cst_19 {dimension_numbers = #tpu.dot_dimension_numbers<[1], [0], [0], [1], [0, 0, 1, 1], [], []>} : vector<128x128xf32>, vector<128x128xf32>, vector<128x128xf32> -> vector<128x128xf32>
    %c0_20 = arith.constant 0 : index
    %c0_21 = arith.constant 0 : index
    %34 = vector.load %arg9[%c0_20, %c0_21] : memref<1x128xf32, #tpu.memory_space<vmem>>, vector<1x128xf32>
    %35 = vector.broadcast %34 : vector<1x128xf32> to vector<128x128xf32>
    %36 = arith.addf %33, %35 : vector<128x128xf32>
    %cst_22 = arith.constant 0.000000e+00 : f32
    %37 = vector.broadcast %cst_22 : f32 to vector<128x128xf32>
    %38 = arith.maximumf %36, %37 : vector<128x128xf32>
    %c0_23 = arith.constant 0 : index
    %c0_24 = arith.constant 0 : index
    %39 = vector.load %arg10[%c0_23, %c0_24] : memref<128x128xf32, #tpu.memory_space<vmem>>, vector<128x128xf32>
    %cst_25 = arith.constant dense<0.000000e+00> : vector<128x128xf32>
    %40 = tpu.matmul %38, %39, %cst_25 {dimension_numbers = #tpu.dot_dimension_numbers<[1], [0], [0], [1], [0, 0, 1, 1], [], []>} : vector<128x128xf32>, vector<128x128xf32>, vector<128x128xf32> -> vector<128x128xf32>
    %c0_26 = arith.constant 0 : index
    %c0_27 = arith.constant 0 : index
    %41 = vector.load %arg11[%c0_26, %c0_27] : memref<1x128xf32, #tpu.memory_space<vmem>>, vector<1x128xf32>
    %42 = vector.broadcast %41 : vector<1x128xf32> to vector<128x128xf32>
    %43 = arith.addf %40, %42 : vector<128x128xf32>
    %c0_28 = arith.constant 0 : index
    %c0_29 = arith.constant 0 : index
    %44 = vector.load %arg12[%c0_28, %c0_29] : memref<128x128xf32, #tpu.memory_space<vmem>>, vector<128x128xf32>
    tpu.vector_store %arg12[%c0_28, %c0_29], %43 {strides = array<i32>} : memref<128x128xf32, #tpu.memory_space<vmem>>, vector<128x128xf32>,
    return
  }
  func.func @transform_0(%arg0: i32) -> (i32, i32) {
    %c0_i32 = arith.constant 0 : i32
    %c0_i32_0 = arith.constant 0 : i32
    return %arg0, %c0_i32 : i32, i32
  }
  func.func @transform_1(%arg0: i32) -> (i32, i32) {
    %c0_i32 = arith.constant 0 : i32
    %c0_i32_0 = arith.constant 0 : i32
    %c0_i32_1 = arith.constant 0 : i32
    return %c0_i32, %c0_i32_0 : i32, i32
  }
  func.func @transform_2(%arg0: i32) -> (i32, i32) {
    %c0_i32 = arith.constant 0 : i32
    %c0_i32_0 = arith.constant 0 : i32
    %c0_i32_1 = arith.constant 0 : i32
    return %c0_i32, %c0_i32_0 : i32, i32
  }
  func.func @transform_3(%arg0: i32) -> (i32, i32) {
    %c0_i32 = arith.constant 0 : i32
    %c0_i32_0 = arith.constant 0 : i32
    %c0_i32_1 = arith.constant 0 : i32
    return %c0_i32, %c0_i32_0 : i32, i32
  }
  func.func @transform_4(%arg0: i32) -> (i32, i32) {
    %c0_i32 = arith.constant 0 : i32
    %c0_i32_0 = arith.constant 0 : i32
    %c0_i32_1 = arith.constant 0 : i32
    return %c0_i32, %c0_i32_0 : i32, i32
  }
  func.func @transform_5(%arg0: i32) -> (i32, i32) {
    %c0_i32 = arith.constant 0 : i32
    %c0_i32_0 = arith.constant 0 : i32
    %c0_i32_1 = arith.constant 0 : i32
    return %c0_i32, %c0_i32_0 : i32, i32
  }
  func.func @transform_6(%arg0: i32) -> (i32, i32) {
    %c0_i32 = arith.constant 0 : i32
    %c0_i32_0 = arith.constant 0 : i32
    %c0_i32_1 = arith.constant 0 : i32
    return %c0_i32, %c0_i32_0 : i32, i32
  }
  func.func @transform_7(%arg0: i32) -> (i32, i32) {
    %c0_i32 = arith.constant 0 : i32
    %c0_i32_0 = arith.constant 0 : i32
    %c0_i32_1 = arith.constant 0 : i32
    return %c0_i32, %c0_i32_0 : i32, i32
  }
  func.func @transform_8(%arg0: i32) -> (i32, i32) {
    %c0_i32 = arith.constant 0 : i32
    %c0_i32_0 = arith.constant 0 : i32
    %c0_i32_1 = arith.constant 0 : i32
    return %c0_i32, %c0_i32_0 : i32, i32
  }
  func.func @transform_9(%arg0: i32) -> (i32, i32) {
    %c0_i32 = arith.constant 0 : i32
    %c0_i32_0 = arith.constant 0 : i32
    %c0_i32_1 = arith.constant 0 : i32
    return %c0_i32, %c0_i32_0 : i32, i32
  }
  func.func @transform_10(%arg0: i32) -> (i32, i32) {
    %c0_i32 = arith.constant 0 : i32
    %c0_i32_0 = arith.constant 0 : i32
    %c0_i32_1 = arith.constant 0 : i32
    return %c0_i32, %c0_i32_0 : i32, i32
  }
  func.func @transform_11(%arg0: i32) -> (i32, i32) {
    %c0_i32 = arith.constant 0 : i32
    %c0_i32_0 = arith.constant 0 : i32
    return %arg0, %c0_i32 : i32, i32
  }
}

</mosaic_0001>

<bundles_post_ra>
// kernel: scorenet_forward.1
= control target key start
LH: loop header
LB: loop body
LE: loop exit
PB: predicated region body
PF: predicated region fallthrough
CT: control target
= control target key end

     0   :  { %16 = vsyncpa [#allocation3], 0  ;;  %s2348_s0 = inlined_call_operand.vmem [shape: f32[256,2], index: 0, kind: input, shape index: {}]   ;;  %s2349_s1 = inlined_call_operand.vmem [shape: f32[2,128], index: 1, kind: input, shape index: {}]   ;;  %s2350_s2 = inlined_call_operand.vmem [shape: f32[1,128], index: 2, kind: input, shape index: {}]   ;;  %s2351_s3 = inlined_call_operand.vmem [shape: f32[128,128], index: 3, kind: input, shape index: {}]   ;;  %s2352_s4 = inlined_call_operand.vmem [shape: f32[1,128], index: 4, kind: input, shape index: {}]   ;;  %s2353_s5 = inlined_call_operand.vmem [shape: f32[128,128], index: 5, kind: input, shape index: {}]   ;;  %s2354_s6 = inlined_call_operand.vmem [shape: f32[1,128], index: 6, kind: input, shape index: {}]   ;;  %s2355_s7 = inlined_call_operand.hbm [shape: f32[128,128], index: 7, kind: input, shape index: {}]   ;;  %s2356_s8 = inlined_call_operand.vmem [shape: f32[1,128], index: 8, kind: input, shape index: {}]   ;;  %s2357_s9 = inlined_call_operand.hbm [shape: f32[128,128], index: 9, kind: input, shape index: {}]   ;;  %s2358_s10 = inlined_call_operand.vmem [shape: f32[1,128], index: 10, kind: input, shape index: {}]   ;;  %s2359_s11 = inlined_call_operand.vmem [shape: f32[256,128], index: 11, kind: output, shape index: {}]  }
   0x1   :  { %17 = vsyncpa [#allocation5], 0  ;;  %s2047_s17 = smov 0  }
   0x2 LB: > { %s1490_s18 = sadd.s32 4294967295, %s1979_s17   ;;  %p1492_p0 = scmp.ge.s32.totalorder %s1979_s17, 1  ;;  %s1979_s17 = sphi %s2047_s17, %s23_s17  }
   0x3   : > { %p290_p1 = scmp.lt.s32.totalorder %s1979_s17, 3  ;;  %s1981_s19 = smov [#allocation2]  }
   0x4   : > { %s320_s20 = sshll.u32 %s1981_s19, 4  ;;  %p2061_p3 = scmp.eq.s32.totalorder %s1490_s18, 0  ;;  %s321_s20 = int_to_ptr.vmem [resolvable:$true] %s320_s20 }
   0x5   : > { %p2055_p2 = pnand %p1492_p0, %p290_p1  ;;  %s1982_s23 = smov [#allocation4]  }
   0x6   : > { %s336_s24 = sshll.u32 %s1982_s23, 4  ;;  %s1924_s26 = scalar_lea.vmem %s321_s20, 2048  ;;  %s337_s24 = int_to_ptr.vmem [resolvable:$true] %s336_s24 }
   0x7   : > { %p1870_p4 = pneg %p2055_p2  ;;  %p1925_p7 = scmp.ne.s32.totalorder %s321_s20, %s1924_s26 }
   0x8   : > { %p1932_p10 = scmp.lt.s32.totalorder %s321_s20, %s321_s20  ;;  %p1933_p11 = scmp.lt.s32.totalorder %s1924_s26, %s1924_s26 }
   0x9   : > { %p2069_p5 = pnand %p2061_p3, %p1870_p4 }
   0xa   : > { %p1934_p12 = por %p1933_p11, %p1932_p10 }
   0xb   : > { %p1915_p6 = pneg %p2069_p5 }
   0xd   : > { %p1927_p8 = pnand %p1925_p7, %p1915_p6 }
   0xf   : > { %p1928_p9 = pneg %p1927_p8 }
  0x11   : > { %p1935_p13 = pnand %p1934_p12, %p1928_p9 }
  0x13   : > { %1938 = shalt.err (!%p1935_p13)
}
  0x14   : > { %s1983_s27 = smov 128   ;;  %s1984_s28 = smov 8  }
  0x15   : > { %1873 = dma.hbm_to_vmem [thread:$0]  (!%p2069_p5), %s2355_s7, 2048, %s321_s20, [#allocation3], %s1983_s27, %s1983_s27, %s1984_s28  }
  0x16   : > { %s1950_s12 = scalar_lea.vmem %s337_s24, 2048  ;;  %p1958_p7 = scmp.lt.s32.totalorder %s337_s24, %s337_s24 }
  0x17   : > { %p1951_p0 = scmp.ne.s32.totalorder %s337_s24, %s1950_s12  ;;  %p1959_p8 = scmp.lt.s32.totalorder %s1950_s12, %s1950_s12 }
  0x19   : > { %p1953_p1 = pnand %p1951_p0, %p1915_p6  ;;  %p1960_p10 = por %p1959_p8, %p1958_p7 }
  0x1b   : > { %p1954_p4 = pneg %p1953_p1 }
  0x1d   : > { %p1961_p9 = pnand %p1960_p10, %p1954_p4 }
  0x1f   : > { %1964 = shalt.err (!%p1961_p9)
}
  0x20   : > { %1876 = dma.hbm_to_vmem [thread:$0]  (!%p2069_p5), %s2357_s9, 2048, %s337_s24, [#allocation5], %s1983_s27, %s1983_s27, %s1984_s28  }
  0x21   : > { %364 = sbr.rel (%p2055_p2) target bundleno = 1062 (0x426), region = 64 }
  0x26   : > { %1970 = dma.done.wait (%p2061_p3), [#allocation3], 2048  }
  0x27   : > { %1972 = vsyncadd (%p2061_p3), [#allocation3], 4294965248 }
  0x28   : > { %1974 = dma.done.wait (%p2061_p3), [#allocation5], 2048  }
  0x29   : > { %1976 = vsyncadd (%p2061_p3), [#allocation5], 4294965248  ;;  %s1499_s15 = sshll.u32 %s1490_s18, 4  ;;  %v1985_v0 = vmov 1   ;;  %v691_v5 = vld [vmem:[%s2351_s3 + $0x78] sm:$0xff]  ;;  %v690_v6 = vld [vmem:[%s2351_s3 + $0x70] sm:$0xff]  ;;  %v518_v46 = vlaneseq }
  0x2a   : > { %1897 = vset.pattern.permute.xlu0 %v1985_v0  ;;  %1895 = vset.pattern.permute.xlu1 %v1985_v0  ;;  %p409_p2 = scmp.lt.s32.totalorder %s1499_s15, 31  ;;  %v689_v9 = vld [vmem:[%s2351_s3 + $0x68] sm:$0xff]  ;;  %v1986_v10 = vmov 0   ;;  %v688_v11 = vld [vmem:[%s2351_s3 + $0x60] sm:$0xff]  ;;  %v687_v12 = vld [vmem:[%s2351_s3 + $0x58] sm:$0xff] }
  0x2b   : > { %1638 = vmatprep.subr.mxu0 %v691_v5  ;;  %v686_v13 = vld [vmem:[%s2351_s3 + $0x50] sm:$0xff]  ;;  %v685_v15 = vld [vmem:[%s2351_s3 + $0x48] sm:$0xff]  ;;  %v684_v16 = vld [vmem:[%s2351_s3 + $0x40] sm:$0xff]  ;;  %v519_v49 = vshrl.u32 %v518_v46, 7 }
  0x2c   : > { %s2364_s15 = smov (!%p409_p2, %s1499_s15), 31  ;;  %1639 = vmatpush3.msra.mxu0 %v691_v5  ;;  %v683_v17 = vld [vmem:[%s2351_s3 + $0x38] sm:$0xff]  ;;  %v682_v19 = vld [vmem:[%s2351_s3 + $0x30] sm:$0xff]  ;;  %v681_v20 = vld [vmem:[%s2351_s3 + $0x28] sm:$0xff] }
  0x2d   : > { %s1500_s16 = sshll.u32 %s2364_s15, 3  ;;  %1640 = vmatprep.subr.mxu0 %v690_v6  ;;  %v680_v21 = vld [vmem:[%s2351_s3 + $0x20] sm:$0xff]  ;;  %v679_v22 = vld [vmem:[%s2351_s3 + $0x18] sm:$0xff]  ;;  %v678_v25 = vld [vmem:[%s2351_s3 + $0x10] sm:$0xff]  ;;  %v626_v52 = vsub.s32 1, %v519_v49  ;;  %v520_v54 = vsub.s32 0, %v519_v49 }
  0x2e   : > { %s2113_s21 = scalar_lea.vmem %s2348_s0, %s1500_s16  ;;  %1641 = vmatpush3.msra.mxu0 %v690_v6  ;;  %v677_v26 = vld [vmem:[%s2351_s3 + $0x8] sm:$0xff]  ;;  %v676_v27 = vld [vmem:[%s2351_s3] sm:$0xff]  ;;  %v875_v34 = vld [vmem:[%s2353_s5 + $0x78] sm:$0xff]  ;;  %s2327_s18 = scalar_lea.vmem %s2359_s11, %s1500_s16 }
  0x2f   : > { %v422_v1 = vld [vmem:[%s2113_s21 + $0x10] sm:$0xff]  ;;  %v420_v2 = vld [vmem:[%s2113_s21] sm:$0xff]  ;;  %v421_v4 = vld [vmem:[%s2113_s21 + $0x8] sm:$0xff]  ;;  %1642 = vmatprep.subr.mxu0 %v689_v9  ;;  %1694 = vmatprep.subr.mxu1 %v875_v34 }
  0x30   : > { %569 = vperm.xlu0 %1897, %v422_v1   ;;  %561 = vperm.xlu1 %1895, %v420_v2   ;;  %v426_v3 = vld [vmem:[%s2113_s21 + $0x30] sm:$0xff]  ;;  %v423_v8 = vld [vmem:[%s2113_s21 + $0x18] sm:$0xff]  ;;  %v424_v14 = vld [vmem:[%s2113_s21 + $0x20] sm:$0xff] }
  0x31   : > { %v2126_v7 = vld [vmem:[%s2113_s21 + $0x50] sm:$0xff]  ;;  %1643 = vmatpush3.msra.mxu0 %v689_v9  ;;  %v425_v18 = vld [vmem:[%s2113_s21 + $0x28] sm:$0xff]  ;;  %v427_v24 = vld [vmem:[%s2113_s21 + $0x38] sm:$0xff]  ;;  %1695 = vmatpush3.msra.mxu1 %v875_v34 }
  0x32   : > { %1644 = vmatprep.subr.mxu0 %v688_v11  ;;  %v429_v23 = vld [vmem:[%s2113_s21 + $0x48] sm:$0xff]  ;;  %v428_v29 = vld [vmem:[%s2113_s21 + $0x40] sm:$0xff]  ;;  %v434_v30 = vld [vmem:[%s2113_s21 + $0x70] sm:$0xff] }
  0x33   : > { %1645 = vmatpush3.msra.mxu0 %v688_v11  ;;  %v433_v28 = vld [vmem:[%s2113_s21 + $0x68] sm:$0xff]  ;;  %v431_v31 = vld [vmem:[%s2113_s21 + $0x58] sm:$0xff]  ;;  %v432_v32 = vld [vmem:[%s2113_s21 + $0x60] sm:$0xff] }
  0x34   : > { %585 = vperm.xlu0 %1897, %v426_v3   ;;  %565 = vperm.xlu1 %1895, %v421_v4   ;;  %v435_v33 = vld [vmem:[%s2113_s21 + $0x78] sm:$0xff]  ;;  %v874_v35 = vld [vmem:[%s2353_s5 + $0x70] sm:$0xff]  ;;  %v873_v36 = vld [vmem:[%s2353_s5 + $0x68] sm:$0xff] }
  0x35   : > { %1646 = vmatprep.subr.mxu0 %v687_v12  ;;  %1696 = vmatprep.subr.mxu1 %v874_v35  ;;  %v872_v37 = vld [vmem:[%s2353_s5 + $0x60] sm:$0xff]  ;;  %v871_v38 = vld [vmem:[%s2353_s5 + $0x58] sm:$0xff]  ;;  %v870_v39 = vld [vmem:[%s2353_s5 + $0x50] sm:$0xff] }
  0x36   : > { %1647 = vmatpush3.msra.mxu0 %v687_v12  ;;  %1697 = vmatpush3.msra.mxu1 %v874_v35  ;;  %v869_v40 = vld [vmem:[%s2353_s5 + $0x48] sm:$0xff]  ;;  %v868_v41 = vld [vmem:[%s2353_s5 + $0x40] sm:$0xff]  ;;  %v867_v42 = vld [vmem:[%s2353_s5 + $0x38] sm:$0xff] }
  0x37   : > { %1648 = vmatprep.subr.mxu0 %v686_v13  ;;  %1698 = vmatprep.subr.mxu1 %v873_v36  ;;  %v866_v43 = vld [vmem:[%s2353_s5 + $0x30] sm:$0xff]  ;;  %v865_v44 = vld [vmem:[%s2353_s5 + $0x28] sm:$0xff]  ;;  %v864_v45 = vld [vmem:[%s2353_s5 + $0x20] sm:$0xff] }
  0x38   : > { %601 = vperm.xlu0 %1897, %v2126_v7   ;;  %1896 = vset.pattern.permute.xlu1 %v1986_v10  ;;  %v436_v55 = vld [vmem:[%s2349_s1] sm:$0x3] }
  0x39   : > { %455 = vperm.xlu1 %1896, %v423_v8   ;;  %1649 = vmatpush3.msra.mxu0 %v686_v13  ;;  %v2240_v57 = vrot.slane %v436_v55, %v626_v52  ;;  %v2242_v58 = vrot.slane %v436_v55, %v520_v54  ;;  %v2248_v62 = vld [vmem:[%s2350_s2] ss:$0 sm:$0xff] }
  0x3a   : > { %1650 = vmatprep.subr.mxu0 %v685_v15  ;;  %1699 = vmatpush3.msra.mxu1 %v873_v36 }
  0x3b   : > { %1651 = vmatpush3.msra.mxu0 %v685_v15  ;;  %1700 = vmatprep.subr.mxu1 %v872_v37 }
  0x3c   : > { %1906 = vset.pattern.permute.xlu0 %v1986_v10  ;;  %1652 = vmatprep.subr.mxu0 %v684_v16 }
  0x3d   : > { %440 = vperm.xlu0 %1906, %v420_v2   ;;  %1898 = vset.pattern.permute.xlu1 %v1985_v0 }
  0x3e   : > { %573 = vperm.xlu1 %1898, %v423_v8   ;;  %1653 = vmatpush3.msra.mxu0 %v684_v16 }
  0x3f   : > { %1654 = vmatprep.subr.mxu0 %v683_v17  ;;  %1701 = vmatpush3.msra.mxu1 %v872_v37 }
  0x40   : > { %1655 = vmatpush3.msra.mxu0 %v683_v17  ;;  %1702 = vmatprep.subr.mxu1 %v871_v38 }
  0x41   : > { %445 = vperm.xlu0 %1906, %v421_v4   ;;  %1656 = vmatprep.subr.mxu0 %v682_v19 }
  0x42   : > { %1899 = vset.pattern.permute.xlu1 %v1986_v10  ;;  %1657 = vmatpush3.msra.mxu0 %v682_v19 }
  0x43   : > { %460 = vperm.xlu1 %1899, %v424_v14   ;;  %1658 = vmatprep.subr.mxu0 %v681_v20 }
  0x44   : > { %1659 = vmatpush3.msra.mxu0 %v681_v20  ;;  %1703 = vmatpush3.msra.mxu1 %v871_v38 }
  0x45   : > { %450 = vperm.xlu0 %1906, %v422_v1   ;;  %1660 = vmatprep.subr.mxu0 %v680_v21 }
  0x46   : > { %1661 = vmatpush3.msra.mxu0 %v680_v21  ;;  %1704 = vmatprep.subr.mxu1 %v870_v39 }
  0x47   : > { %1900 = vset.pattern.permute.xlu1 %v1985_v0  ;;  %1662 = vmatprep.subr.mxu0 %v679_v22 }
  0x48   : > { %577 = vperm.xlu1 %1900, %v424_v14   ;;  %1663 = vmatpush3.msra.mxu0 %v679_v22 }
  0x49   : > { %465 = vperm.xlu0 %1906, %v425_v18   ;;  %1664 = vmatprep.subr.mxu0 %v678_v25 }
  0x4a   : > { %1665 = vmatpush3.msra.mxu0 %v678_v25  ;;  %1705 = vmatpush3.msra.mxu1 %v870_v39 }
  0x4b   : > { %1666 = vmatprep.subr.mxu0 %v677_v26  ;;  %1706 = vmatprep.subr.mxu1 %v869_v40 }
  0x4c   : > { %581 = vperm.xlu1 %1900, %v425_v18   ;;  %1667 = vmatpush3.msra.mxu0 %v677_v26 }
  0x4d   : > { %470 = vperm.xlu0 %1906, %v426_v3   ;;  %1668 = vmatprep.subr.mxu0 %v676_v27 }
  0x4e   : > { %1669 = vmatpush3.msra.mxu0 %v676_v27  ;;  %1707 = vmatpush3.msra.mxu1 %v869_v40 }
  0x4f   : > { %1708 = vmatprep.subr.mxu1 %v868_v41 }
  0x50   : > { %1901 = vset.pattern.permute.xlu1 %v1986_v10  ;;  %1709 = vmatpush3.msra.mxu1 %v868_v41 }
  0x51   : > { %485 = vperm.xlu0 %1906, %v429_v23   ;;  %475 = vperm.xlu1 %1901, %v427_v24  }
  0x52   : > { %1710 = vmatprep.subr.mxu1 %v867_v42 }
  0x53   : > { %1711 = vmatpush3.msra.mxu1 %v867_v42 }
  0x54   : > { %1712 = vmatprep.subr.mxu1 %v866_v43 }
  0x55   : > { %490 = vperm.xlu0 %1906, %v2126_v7   ;;  %1902 = vset.pattern.permute.xlu1 %v1985_v0 }
  0x56   : > { %589 = vperm.xlu1 %1902, %v427_v24   ;;  %1713 = vmatpush3.msra.mxu1 %v866_v43 }
  0x57   : > { %1714 = vmatprep.subr.mxu1 %v865_v44 }
  0x58   : > { %1715 = vmatpush3.msra.mxu1 %v865_v44 }
  0x59   : > { %505 = vperm.xlu0 %1906, %v433_v28   ;;  %1716 = vmatprep.subr.mxu1 %v864_v45 }
  0x5a   : > { %1903 = vset.pattern.permute.xlu1 %v1986_v10  ;;  %1717 = vmatpush3.msra.mxu1 %v864_v45 }
  0x5b   : > { %480 = vperm.xlu1 %1903, %v428_v29  }
  0x5d   : > { %510 = vperm.xlu0 %1906, %v434_v30  }
  0x5f   : > { %1904 = vset.pattern.permute.xlu1 %v1985_v0 }
  0x60   : > { %593 = vperm.xlu1 %1904, %v428_v29  }
  0x61   : > { %1911 = vset.pattern.permute.xlu0 %v1985_v0 }
  0x62   : > { %617 = vperm.xlu0 %1911, %v434_v30  }
  0x64   : > { %597 = vperm.xlu1 %1904, %v429_v23  }
  0x68   : > { %1905 = vset.pattern.permute.xlu1 %v1986_v10 }
  0x69   : > { %495 = vperm.xlu1 %1905, %v431_v31  }
  0x6d   : > { %1907 = vset.pattern.permute.xlu1 %v1985_v0 }
  0x6e   : > { %605 = vperm.xlu1 %1907, %v431_v31  }
  0x72   : > { %1908 = vset.pattern.permute.xlu1 %v1986_v10 }
  0x73   : > { %500 = vperm.xlu1 %1908, %v432_v32  }
  0x77   : > { %1909 = vset.pattern.permute.xlu1 %v1985_v0 }
  0x78   : > { %609 = vperm.xlu1 %1909, %v432_v32  }
  0x7c   : > { %613 = vperm.xlu1 %1909, %v433_v28  }
  0x80   : > { %1910 = vset.pattern.permute.xlu1 %v1986_v10 }
  0x81   : > { %515 = vperm.xlu1 %1910, %v435_v33  }
  0x85   : > { %1912 = vset.pattern.permute.xlu1 %v1985_v0 }
  0x86   : > { %621 = vperm.xlu1 %1912, %v435_v33  }
  0xab   : > { %v562_v47 = vpop.permute.xlu1 %561  ;;  %v570_v48 = vpop.permute.xlu0 %569 }
  0xac   : > { %v628_v63 = vmul.f32 %v2240_v57, %v562_v47  ;;  %v630_v12 = vmul.f32 %v2240_v57, %v570_v48 }
  0xaf   : > { %v566_v50 = vpop.permute.xlu1 %565  ;;  %v586_v51 = vpop.permute.xlu0 %585 }
  0xb0   : > { %v629_v6 = vmul.f32 %v2240_v57, %v566_v50  ;;  %v634_v33 = vmul.f32 %v2240_v57, %v586_v51 }
  0xb3   : > { %v2235_v53 = vpop.permute.xlu0 %601 }
  0xb4   : > { %v456_v56 = vpop.permute.xlu1 %455 }
  0xb5   : > { %v525_v4 = vmul.f32 %v2242_v58, %v456_v56 }
  0xb7   : > { %v547_v15 = vadd.f32 %v2248_v62, %v525_v4 }
  0xb8   : > { %v441_v59 = vpop.permute.xlu0 %440 }
  0xb9   : > { %v522_v60 = vmul.f32 %v2242_v58, %v441_v59  ;;  %v574_v61 = vpop.permute.xlu1 %573 }
  0xba   : > { %v631_v9 = vmul.f32 %v2240_v57, %v574_v61  ;;  %v638_v61 = vmul.f32 %v2240_v57, %v2235_v53 }
  0xbb   : > { %v544_v0 = vadd.f32 %v2248_v62, %v522_v60 }
  0xbc   : > { %v446_v1 = vpop.permute.xlu0 %445  ;;  %v647_v19 = vadd.f32 %v631_v9, %v547_v15 }
  0xbd   : > { %v523_v2 = vmul.f32 %v2242_v58, %v446_v1  ;;  %v644_v3 = vadd.f32 %v628_v63, %v544_v0 }
  0xbe   : > { %v461_v5 = vpop.permute.xlu1 %460  ;;  %v663_v29 = vmax.f32 %v647_v19, 0.0 }
  0xbf   : > { %v545_v7 = vadd.f32 %v2248_v62, %v523_v2  ;;  %v660_v8 = vmax.f32 %v644_v3, 0.0  ;;  %v526_v10 = vmul.f32 %v2242_v58, %v461_v5 }
  0xc0   : > { %v451_v11 = vpop.permute.xlu0 %450 }
  0xc1   : > { %v524_v13 = vmul.f32 %v2242_v58, %v451_v11  ;;  %1670 = vmatprep.mubr.f32.mxu0 %v660_v8  ;;  %v645_v14 = vadd.f32 %v629_v6, %v545_v7  ;;  %v548_v20 = vadd.f32 %v2248_v62, %v526_v10 }
  0xc3   : > { %v546_v16 = vadd.f32 %v2248_v62, %v524_v13  ;;  %v578_v17 = vpop.permute.xlu1 %577  ;;  %v661_v18 = vmax.f32 %v645_v14, 0.0 }
  0xc4   : > { %v632_v21 = vmul.f32 %v2240_v57, %v578_v17  ;;  %v466_v22 = vpop.permute.xlu0 %465 }
  0xc5   : > { %v527_v23 = vmul.f32 %v2242_v58, %v466_v22  ;;  %1671 = vmatmul.mubr.f32.vlgmr.msra.gmra.mxu0 %v661_v18  ;;  %v646_v24 = vadd.f32 %v630_v12, %v546_v16 }
  0xc6   : > { %v648_v25 = vadd.f32 %v632_v21, %v548_v20 }
  0xc7   : > { %v549_v26 = vadd.f32 %v2248_v62, %v527_v23  ;;  %v582_v27 = vpop.permute.xlu1 %581  ;;  %v662_v28 = vmax.f32 %v646_v24, 0.0 }
  0xc8   : > { %v664_v30 = vmax.f32 %v648_v25, 0.0  ;;  %v633_v31 = vmul.f32 %v2240_v57, %v582_v27  ;;  %v471_v32 = vpop.permute.xlu0 %470 }
  0xc9   : > { %v528_v34 = vmul.f32 %v2242_v58, %v471_v32  ;;  %1673 = vmatprep.mubr.f32.mxu0 %v662_v28 }
  0xca   : > { %v649_v35 = vadd.f32 %v633_v31, %v549_v26  ;;  %1674 = vmatmul.mubr.f32.gmra.mxu0 %v663_v29 }
  0xcb   : > { %v550_v36 = vadd.f32 %v2248_v62, %v528_v34  ;;  %1676 = vmatprep.mubr.f32.mxu0 %v664_v30 }
  0xcc   : > { %v665_v37 = vmax.f32 %v649_v35, 0.0  ;;  %v476_v38 = vpop.permute.xlu1 %475  ;;  %v486_v42 = vpop.permute.xlu0 %485 }
  0xcd   : > { %v650_v39 = vadd.f32 %v634_v33, %v550_v36  ;;  %v529_v40 = vmul.f32 %v2242_v58, %v476_v38  ;;  %v531_v54 = vmul.f32 %v2242_v58, %v486_v42  ;;  %v862_v42 = vld [vmem:[%s2353_s5 + $0x10] sm:$0xff] }
  0xce   : > { %1677 = vmatmul.mubr.f32.gmra.mxu0 %v665_v37 }
  0xcf   : > { %v666_v41 = vmax.f32 %v650_v39, 0.0  ;;  %v551_v44 = vadd.f32 %v2248_v62, %v529_v40  ;;  %v553_v0 = vadd.f32 %v2248_v62, %v531_v54  ;;  %v863_v40 = vld [vmem:[%s2353_s5 + $0x18] sm:$0xff]  ;;  %v1048_v54 = vld [vmem:[#allocation2 + $0x20] sm:$0xff] }
  0xd0   : > { %v491_v47 = vpop.permute.xlu0 %490  ;;  %1718 = vmatprep.subr.mxu1 %v863_v40 }
  0xd1   : > { %v590_v43 = vpop.permute.xlu1 %589  ;;  %1679 = vmatprep.mubr.f32.mxu0 %v666_v41  ;;  %v532_v51 = vmul.f32 %v2242_v58, %v491_v47  ;;  %1719 = vmatpush3.msra.mxu1 %v863_v40  ;;  %v1054_v47 = vld [vmem:[#allocation2 + $0x50] sm:$0xff]  ;;  %v1047_v40 = vld [vmem:[#allocation2 + $0x18] sm:$0xff] }
  0xd2   : > { %v635_v45 = vmul.f32 %v2240_v57, %v590_v43  ;;  %1720 = vmatprep.subr.mxu1 %v862_v42  ;;  %v1058_v43 = vld [vmem:[#allocation2 + $0x70] sm:$0xff] }
  0xd3   : > { %v554_v59 = vadd.f32 %v2248_v62, %v532_v51  ;;  %1721 = vmatpush3.msra.mxu1 %v862_v42  ;;  %v1050_v51 = vld [vmem:[#allocation2 + $0x30] sm:$0xff] }
  0xd4   : > { %v651_v46 = vadd.f32 %v635_v45, %v551_v44  ;;  %v506_v8 = vpop.permute.xlu0 %505  ;;  %v1057_v44 = vld [vmem:[#allocation2 + $0x68] sm:$0xff]  ;;  %v1056_v45 = vld [vmem:[#allocation2 + $0x60] sm:$0xff] }
  0xd5   : > { %v654_v3 = vadd.f32 %v638_v61, %v554_v59  ;;  %v535_v20 = vmul.f32 %v2242_v58, %v506_v8 }
  0xd6   : > { %v667_v48 = vmax.f32 %v651_v46, 0.0  ;;  %v481_v49 = vpop.permute.xlu1 %480  ;;  %v1055_v46 = vld [vmem:[#allocation2 + $0x58] sm:$0xff] }
  0xd7   : > { %v530_v50 = vmul.f32 %v2242_v58, %v481_v49  ;;  %v670_v7 = vmax.f32 %v654_v3, 0.0  ;;  %v557_v27 = vadd.f32 %v2248_v62, %v535_v20  ;;  %v1052_v49 = vld [vmem:[#allocation2 + $0x40] sm:$0xff] }
  0xd8   : > { %1680 = vmatmul.mubr.f32.gmra.mxu0 %v667_v48  ;;  %v511_v12 = vpop.permute.xlu0 %510  ;;  %v1053_v48 = vld [vmem:[#allocation2 + $0x48] sm:$0xff] }
  0xd9   : > { %v552_v55 = vadd.f32 %v2248_v62, %v530_v50  ;;  %v536_v17 = vmul.f32 %v2242_v58, %v511_v12  ;;  %v1051_v50 = vld [vmem:[#allocation2 + $0x38] sm:$0xff] }
  0xdb   : > { %v594_v52 = vpop.permute.xlu1 %593  ;;  %v558_v23 = vadd.f32 %v2248_v62, %v536_v17 }
  0xdc   : > { %v636_v56 = vmul.f32 %v2240_v57, %v594_v52  ;;  %v1049_v52 = vld [vmem:[#allocation2 + $0x28] sm:$0xff] }
  0xdd   : > { %v618_v18 = vpop.permute.xlu0 %617 }
  0xde   : > { %v652_v60 = vadd.f32 %v636_v56, %v552_v55  ;;  %v642_v24 = vmul.f32 %v2240_v57, %v618_v18  ;;  %v1504_v55 = vld [vmem:[%s2352_s4] ss:$0 sm:$0xff] }
  0xdf   : > { %v598_v63 = vpop.permute.xlu1 %597 }
  0xe0   : > { %v668_v1 = vmax.f32 %v652_v60, 0.0  ;;  %v637_v2 = vmul.f32 %v2240_v57, %v598_v63  ;;  %v658_v30 = vadd.f32 %v642_v24, %v558_v23 }
  0xe2   : > { %v653_v4 = vadd.f32 %v637_v2, %v553_v0  ;;  %1682 = vmatprep.mubr.f32.mxu0 %v668_v1  ;;  %v674_v34 = vmax.f32 %v658_v30, 0.0 }
  0xe4   : > { %v669_v5 = vmax.f32 %v653_v4, 0.0  ;;  %v496_v6 = vpop.permute.xlu1 %495 }
  0xe5   : > { %v533_v9 = vmul.f32 %v2242_v58, %v496_v6 }
  0xe6   : > { %1683 = vmatmul.mubr.f32.gmra.mxu0 %v669_v5 }
  0xe7   : > { %1685 = vmatprep.mubr.f32.mxu0 %v670_v7  ;;  %v555_v53 = vadd.f32 %v2248_v62, %v533_v9 }
  0xe9   : > { %v606_v10 = vpop.permute.xlu1 %605 }
  0xea   : > { %v639_v11 = vmul.f32 %v2240_v57, %v606_v10 }
  0xec   : > { %v655_v13 = vadd.f32 %v639_v11, %v555_v53 }
  0xee   : > { %v671_v14 = vmax.f32 %v655_v13, 0.0  ;;  %v501_v15 = vpop.permute.xlu1 %500 }
  0xef   : > { %v534_v16 = vmul.f32 %v2242_v58, %v501_v15 }
  0xf0   : > { %1686 = vmatmul.mubr.f32.gmra.mxu0 %v671_v14 }
  0xf1   : > { %v556_v21 = vadd.f32 %v2248_v62, %v534_v16 }
  0xf3   : > { %v610_v19 = vpop.permute.xlu1 %609 }
  0xf4   : > { %v640_v22 = vmul.f32 %v2240_v57, %v610_v19 }
  0xf6   : > { %v656_v25 = vadd.f32 %v640_v22, %v556_v21 }
  0xf7   : > { %v614_v26 = vpop.permute.xlu1 %613 }
  0xf8   : > { %v672_v28 = vmax.f32 %v656_v25, 0.0  ;;  %v641_v29 = vmul.f32 %v2240_v57, %v614_v26 }
  0xfa   : > { %v657_v31 = vadd.f32 %v641_v29, %v557_v27  ;;  %1688 = vmatprep.mubr.f32.mxu0 %v672_v28 }
  0xfc   : > { %v673_v32 = vmax.f32 %v657_v31, 0.0  ;;  %v516_v33 = vpop.permute.xlu1 %515 }
  0xfd   : > { %v537_v35 = vmul.f32 %v2242_v58, %v516_v33  ;;  %v861_v58 = vld [vmem:[%s2353_s5 + $0x8] sm:$0xff] }
  0xfe   : > { %1689 = vmatmul.mubr.f32.gmra.mxu0 %v673_v32  ;;  %1722 = vmatprep.subr.mxu1 %v861_v58 }
  0xff   : > { %1691 = vmatprep.mubr.f32.mxu0 %v674_v34  ;;  %v559_v37 = vadd.f32 %v2248_v62, %v537_v35  ;;  %1723 = vmatpush3.msra.mxu1 %v861_v58  ;;  %v1059_v62 = vld [vmem:[#allocation2 + $0x78] sm:$0xff]  ;;  %v1046_v58 = vld [vmem:[#allocation2 + $0x10] sm:$0xff] }
 0x100   : > { %1750 = vmatprep.subr.mxu0 %v1059_v62 }
 0x101   : > { %v622_v36 = vpop.permute.xlu1 %621  ;;  %1751 = vmatpush3.msra.mxu0 %v1059_v62  ;;  %v1044_v62 = vld [vmem:[#allocation2] sm:$0xff] }
 0x102   : > { %v643_v38 = vmul.f32 %v2240_v57, %v622_v36  ;;  %v860_v57 = vld [vmem:[%s2353_s5] sm:$0xff]  ;;  %1752 = vmatprep.subr.mxu0 %v1058_v43 }
 0x103   : > { %1724 = vmatprep.subr.mxu1 %v860_v57  ;;  %1753 = vmatpush3.msra.mxu0 %v1058_v43  ;;  %v1243_v43 = vld [vmem:[#allocation4 + $0x78] sm:$0xff] }
 0x104   : > { %v659_v39 = vadd.f32 %v643_v38, %v559_v37  ;;  %1725 = vmatpush3.msra.mxu1 %v860_v57  ;;  %1754 = vmatprep.subr.mxu0 %v1057_v44  ;;  %v1045_v57 = vld [vmem:[#allocation2 + $0x8] sm:$0xff] }
 0x105   : > { %1755 = vmatpush3.msra.mxu0 %v1057_v44  ;;  %v1242_v44 = vld [vmem:[#allocation4 + $0x70] sm:$0xff]  ;;  %1806 = vmatprep.subr.mxu1 %v1243_v43 }
 0x106   : > { %v675_v41 = vmax.f32 %v659_v39, 0.0  ;;  %1756 = vmatprep.subr.mxu0 %v1056_v45 }
 0x107   : > { %1757 = vmatpush3.msra.mxu0 %v1056_v45  ;;  %v1241_v45 = vld [vmem:[#allocation4 + $0x68] sm:$0xff] }
 0x108   : > { %1692 = vmatmul.mubr.f32.gmra.mxu0 %v675_v41  ;;  %1758 = vmatprep.subr.mxu0 %v1055_v46 }
 0x109   : > { %1759 = vmatpush3.msra.mxu0 %v1055_v46  ;;  %v1240_v46 = vld [vmem:[#allocation4 + $0x60] sm:$0xff] }
 0x10a   : > { %1760 = vmatprep.subr.mxu0 %v1054_v47 }
 0x10b   : > { %1761 = vmatpush3.msra.mxu0 %v1054_v47  ;;  %v1239_v47 = vld [vmem:[#allocation4 + $0x58] sm:$0xff] }
 0x10c   : > { %1762 = vmatprep.subr.mxu0 %v1053_v48 }
 0x10d   : > { %1763 = vmatpush3.msra.mxu0 %v1053_v48  ;;  %v1238_v48 = vld [vmem:[#allocation4 + $0x50] sm:$0xff] }
 0x10e   : > { %1764 = vmatprep.subr.mxu0 %v1052_v49 }
 0x10f   : > { %1765 = vmatpush3.msra.mxu0 %v1052_v49  ;;  %v1237_v49 = vld [vmem:[#allocation4 + $0x48] sm:$0xff] }
 0x110   : > { %1766 = vmatprep.subr.mxu0 %v1051_v50 }
 0x111   : > { %1767 = vmatpush3.msra.mxu0 %v1051_v50  ;;  %v1236_v50 = vld [vmem:[#allocation4 + $0x40] sm:$0xff] }
 0x112   : > { %1768 = vmatprep.subr.mxu0 %v1050_v51 }
 0x113   : > { %1769 = vmatpush3.msra.mxu0 %v1050_v51  ;;  %v1235_v51 = vld [vmem:[#allocation4 + $0x38] sm:$0xff] }
 0x114   : > { %1770 = vmatprep.subr.mxu0 %v1049_v52 }
 0x115   : > { %1771 = vmatpush3.msra.mxu0 %v1049_v52  ;;  %v1234_v52 = vld [vmem:[#allocation4 + $0x30] sm:$0xff] }
 0x116   : > { %1772 = vmatprep.subr.mxu0 %v1048_v54 }
 0x117   : > { %1773 = vmatpush3.msra.mxu0 %v1048_v54  ;;  %v1233_v54 = vld [vmem:[#allocation4 + $0x28] sm:$0xff] }
 0x118   : > { %1774 = vmatprep.subr.mxu0 %v1047_v40 }
 0x119   : > { %1775 = vmatpush3.msra.mxu0 %v1047_v40 }
 0x11a   : > { %1776 = vmatprep.subr.mxu0 %v1046_v58 }
 0x11b   : > { %1777 = vmatpush3.msra.mxu0 %v1046_v58 }
 0x11c   : > { %1778 = vmatprep.subr.mxu0 %v1045_v57 }
 0x11d   : > { %1779 = vmatpush3.msra.mxu0 %v1045_v57  ;;  %v1230_v57 = vld [vmem:[#allocation4 + $0x10] sm:$0xff] }
 0x11e   : > { %1780 = vmatprep.subr.mxu0 %v1044_v62 }
 0x11f   : > { %1781 = vmatpush3.msra.mxu0 %v1044_v62  ;;  %v1229_v62 = vld [vmem:[#allocation4 + $0x8] sm:$0xff] }
 0x185   : > { %v1672_v56 = vpop.f32.mrf.mxu0 }
 0x186   : > { %v771_v59 = vadd.f32 %v1672_v56, %v1504_v55  ;;  %v1505_v56 = vld [vmem:[%s2354_s6] ss:$0 sm:$0xff] }
 0x187   : > { %v765_v60 = vpop.f32.mrf.mxu0 }
 0x188   : > { %v766_v61 = vadd.f32 %v1504_v55, %v765_v60  ;;  %v845_v1 = vmax.f32 %v771_v59, 0.0 }
 0x18a   : > { %v1675_v63 = vpop.f32.mrf.mxu0  ;;  %v844_v0 = vmax.f32 %v766_v61, 0.0 }
 0x18b   : > { %v781_v2 = vadd.f32 %v1675_v63, %v1504_v55 }
 0x18c   : > { %v775_v3 = vpop.f32.mrf.mxu0  ;;  %1726 = vmatprep.mubr.f32.mxu1 %v844_v0 }
 0x18d   : > { %v776_v4 = vadd.f32 %v1504_v55, %v775_v3  ;;  %1727 = vmatmul.mubr.f32.vlgmr.msra.gmra.mxu1 %v845_v1  ;;  %v847_v7 = vmax.f32 %v781_v2, 0.0 }
 0x18e   : > { %v1678_v5 = vpop.f32.mrf.mxu0  ;;  %1807 = vmatpush3.msra.mxu1 %v1243_v43  ;;  %v1228_v43 = vld [vmem:[#allocation4] sm:$0xff] }
 0x18f   : > { %v846_v6 = vmax.f32 %v776_v4, 0.0  ;;  %v791_v8 = vadd.f32 %v1678_v5, %v1504_v55  ;;  %1808 = vmatprep.subr.mxu1 %v1242_v44 }
 0x190   : > { %v785_v9 = vpop.f32.mrf.mxu0  ;;  %1809 = vmatpush3.msra.mxu1 %v1242_v44  ;;  %v1506_v44 = vld [vmem:[%s2356_s8] ss:$0 sm:$0xff] }
 0x191   : > { %v786_v10 = vadd.f32 %v1504_v55, %v785_v9  ;;  %1729 = vmatprep.mubr.f32.mxu1 %v846_v6  ;;  %v849_v11 = vmax.f32 %v791_v8, 0.0  ;;  %1810 = vmatprep.subr.mxu1 %v1241_v45 }
 0x192   : > { %1730 = vmatmul.mubr.f32.gmra.mxu1 %v847_v7 }
 0x193   : > { %v848_v53 = vmax.f32 %v786_v10, 0.0  ;;  %1811 = vmatpush3.msra.mxu1 %v1241_v45 }
 0x194   : > { %1812 = vmatprep.subr.mxu1 %v1240_v46 }
 0x195   : > { %1732 = vmatprep.mubr.f32.mxu1 %v848_v53  ;;  %1813 = vmatpush3.msra.mxu1 %v1240_v46 }
 0x196   : > { %1733 = vmatmul.mubr.f32.gmra.mxu1 %v849_v11  ;;  %1814 = vmatprep.subr.mxu1 %v1239_v47 }
 0x197   : > { %1815 = vmatpush3.msra.mxu1 %v1239_v47 }
 0x198   : > { %v1681_v12 = vpop.f32.mrf.mxu0  ;;  %1816 = vmatprep.subr.mxu1 %v1238_v48 }
 0x199   : > { %v801_v13 = vadd.f32 %v1681_v12, %v1504_v55  ;;  %1817 = vmatpush3.msra.mxu1 %v1238_v48 }
 0x19a   : > { %v795_v14 = vpop.f32.mrf.mxu0  ;;  %1818 = vmatprep.subr.mxu1 %v1237_v49 }
 0x19b   : > { %v796_v15 = vadd.f32 %v1504_v55, %v795_v14  ;;  %v851_v17 = vmax.f32 %v801_v13, 0.0  ;;  %1819 = vmatpush3.msra.mxu1 %v1237_v49 }
 0x19c   : > { %1820 = vmatprep.subr.mxu1 %v1236_v50 }
 0x19d   : > { %v850_v16 = vmax.f32 %v796_v15, 0.0  ;;  %1821 = vmatpush3.msra.mxu1 %v1236_v50 }
 0x19e   : > { %1822 = vmatprep.subr.mxu1 %v1235_v51 }
 0x19f   : > { %1735 = vmatprep.mubr.f32.mxu1 %v850_v16  ;;  %1823 = vmatpush3.msra.mxu1 %v1235_v51 }
 0x1a0   : > { %1736 = vmatmul.mubr.f32.gmra.mxu1 %v851_v17  ;;  %1824 = vmatprep.subr.mxu1 %v1234_v52 }
 0x1a1   : > { %1825 = vmatpush3.msra.mxu1 %v1234_v52 }
 0x1a2   : > { %1826 = vmatprep.subr.mxu1 %v1233_v54 }
 0x1a3   : > { %1827 = vmatpush3.msra.mxu1 %v1233_v54 }
 0x1a6   : > { %v1684_v18 = vpop.f32.mrf.mxu0 }
 0x1a7   : > { %v811_v19 = vadd.f32 %v1684_v18, %v1504_v55 }
 0x1a8   : > { %v805_v20 = vpop.f32.mrf.mxu0 }
 0x1a9   : > { %v806_v21 = vadd.f32 %v1504_v55, %v805_v20  ;;  %v853_v23 = vmax.f32 %v811_v19, 0.0 }
 0x1ab   : > { %v852_v22 = vmax.f32 %v806_v21, 0.0 }
 0x1ad   : > { %1738 = vmatprep.mubr.f32.mxu1 %v852_v22 }
 0x1ae   : > { %1739 = vmatmul.mubr.f32.gmra.mxu1 %v853_v23 }
 0x1b0   : > { %v1687_v24 = vpop.f32.mrf.mxu0 }
 0x1b1   : > { %v821_v25 = vadd.f32 %v1687_v24, %v1504_v55 }
 0x1b2   : > { %v815_v26 = vpop.f32.mrf.mxu0 }
 0x1b3   : > { %v816_v27 = vadd.f32 %v1504_v55, %v815_v26  ;;  %v855_v29 = vmax.f32 %v821_v25, 0.0 }
 0x1b5   : > { %v854_v28 = vmax.f32 %v816_v27, 0.0 }
 0x1b7   : > { %1741 = vmatprep.mubr.f32.mxu1 %v854_v28 }
 0x1b8   : > { %1742 = vmatmul.mubr.f32.gmra.mxu1 %v855_v29 }
 0x1be   : > { %v1690_v30 = vpop.f32.mrf.mxu0 }
 0x1bf   : > { %v831_v31 = vadd.f32 %v1690_v30, %v1504_v55 }
 0x1c0   : > { %v825_v32 = vpop.f32.mrf.mxu0 }
 0x1c1   : > { %v826_v33 = vadd.f32 %v1504_v55, %v825_v32  ;;  %v857_v35 = vmax.f32 %v831_v31, 0.0 }
 0x1c3   : > { %v856_v34 = vmax.f32 %v826_v33, 0.0 }
 0x1c5   : > { %1744 = vmatprep.mubr.f32.mxu1 %v856_v34 }
 0x1c6   : > { %1745 = vmatmul.mubr.f32.gmra.mxu1 %v857_v35 }
 0x1c8   : > { %v1693_v36 = vpop.f32.mrf.mxu0 }
 0x1c9   : > { %v841_v37 = vadd.f32 %v1693_v36, %v1504_v55 }
 0x1ca   : > { %v835_v38 = vpop.f32.mrf.mxu0 }
 0x1cb   : > { %v836_v39 = vadd.f32 %v1504_v55, %v835_v38  ;;  %v859_v42 = vmax.f32 %v841_v37, 0.0  ;;  %v1232_v55 = vld [vmem:[#allocation4 + $0x20] sm:$0xff] }
 0x1cc   : > { %1828 = vmatprep.subr.mxu1 %v1232_v55 }
 0x1cd   : > { %v858_v41 = vmax.f32 %v836_v39, 0.0  ;;  %1829 = vmatpush3.msra.mxu1 %v1232_v55 }
 0x1cf   : > { %1747 = vmatprep.mubr.f32.mxu1 %v858_v41  ;;  %v1231_v41 = vld [vmem:[#allocation4 + $0x18] sm:$0xff] }
 0x1d0   : > { %1748 = vmatmul.mubr.f32.gmra.mxu1 %v859_v42  ;;  %1830 = vmatprep.subr.mxu1 %v1231_v41 }
 0x1d1   : > { %1831 = vmatpush3.msra.mxu1 %v1231_v41 }
 0x1d2   : > { %1832 = vmatprep.subr.mxu1 %v1230_v57 }
 0x1d3   : > { %1833 = vmatpush3.msra.mxu1 %v1230_v57 }
 0x1d4   : > { %1834 = vmatprep.subr.mxu1 %v1229_v62 }
 0x1d5   : > { %1835 = vmatpush3.msra.mxu1 %v1229_v62 }
 0x1d6   : > { %1836 = vmatprep.subr.mxu1 %v1228_v43 }
 0x1d7   : > { %1837 = vmatpush3.msra.mxu1 %v1228_v43 }
 0x24d   : > { %v1728_v59 = vpop.f32.mrf.mxu1 }
 0x24e   : > { %v955_v60 = vadd.f32 %v1728_v59, %v1505_v56 }
 0x24f   : > { %v949_v61 = vpop.f32.mrf.mxu1 }
 0x250   : > { %v950_v63 = vadd.f32 %v1505_v56, %v949_v61  ;;  %v1029_v2 = vmax.f32 %v955_v60, 0.0 }
 0x252   : > { %v1028_v0 = vmax.f32 %v950_v63, 0.0  ;;  %v1731_v1 = vpop.f32.mrf.mxu1 }
 0x253   : > { %v965_v3 = vadd.f32 %v1731_v1, %v1505_v56 }
 0x254   : > { %v959_v4 = vpop.f32.mrf.mxu1  ;;  %1782 = vmatprep.mubr.f32.mxu0 %v1028_v0 }
 0x255   : > { %v960_v5 = vadd.f32 %v1505_v56, %v959_v4  ;;  %1783 = vmatmul.mubr.f32.vlgmr.msra.gmra.mxu0 %v1029_v2  ;;  %v1031_v8 = vmax.f32 %v965_v3, 0.0 }
 0x256   : > { %v1734_v6 = vpop.f32.mrf.mxu1 }
 0x257   : > { %v1030_v7 = vmax.f32 %v960_v5, 0.0  ;;  %v975_v9 = vadd.f32 %v1734_v6, %v1505_v56 }
 0x258   : > { %v969_v10 = vpop.f32.mrf.mxu1 }
 0x259   : > { %v970_v53 = vadd.f32 %v1505_v56, %v969_v10  ;;  %1785 = vmatprep.mubr.f32.mxu0 %v1030_v7  ;;  %v1033_v12 = vmax.f32 %v975_v9, 0.0 }
 0x25a   : > { %1786 = vmatmul.mubr.f32.gmra.mxu0 %v1031_v8 }
 0x25b   : > { %v1032_v11 = vmax.f32 %v970_v53, 0.0 }
 0x25d   : > { %1788 = vmatprep.mubr.f32.mxu0 %v1032_v11 }
 0x25e   : > { %1789 = vmatmul.mubr.f32.gmra.mxu0 %v1033_v12 }
 0x260   : > { %v1737_v13 = vpop.f32.mrf.mxu1 }
 0x261   : > { %v985_v14 = vadd.f32 %v1737_v13, %v1505_v56 }
 0x262   : > { %v979_v15 = vpop.f32.mrf.mxu1 }
 0x263   : > { %v980_v16 = vadd.f32 %v1505_v56, %v979_v15  ;;  %v1035_v18 = vmax.f32 %v985_v14, 0.0 }
 0x265   : > { %v1034_v17 = vmax.f32 %v980_v16, 0.0 }
 0x267   : > { %1791 = vmatprep.mubr.f32.mxu0 %v1034_v17 }
 0x268   : > { %1792 = vmatmul.mubr.f32.gmra.mxu0 %v1035_v18 }
 0x26e   : > { %v1740_v19 = vpop.f32.mrf.mxu1 }
 0x26f   : > { %v995_v20 = vadd.f32 %v1740_v19, %v1505_v56 }
 0x270   : > { %v989_v21 = vpop.f32.mrf.mxu1 }
 0x271   : > { %v990_v22 = vadd.f32 %v1505_v56, %v989_v21  ;;  %v1037_v24 = vmax.f32 %v995_v20, 0.0 }
 0x273   : > { %v1036_v23 = vmax.f32 %v990_v22, 0.0 }
 0x275   : > { %1794 = vmatprep.mubr.f32.mxu0 %v1036_v23 }
 0x276   : > { %1795 = vmatmul.mubr.f32.gmra.mxu0 %v1037_v24 }
 0x278   : > { %v1743_v25 = vpop.f32.mrf.mxu1 }
 0x279   : > { %v1005_v26 = vadd.f32 %v1743_v25, %v1505_v56 }
 0x27a   : > { %v999_v27 = vpop.f32.mrf.mxu1 }
 0x27b   : > { %v1000_v28 = vadd.f32 %v1505_v56, %v999_v27  ;;  %v1039_v30 = vmax.f32 %v1005_v26, 0.0 }
 0x27d   : > { %v1038_v29 = vmax.f32 %v1000_v28, 0.0 }
 0x27f   : > { %1797 = vmatprep.mubr.f32.mxu0 %v1038_v29 }
 0x280   : > { %1798 = vmatmul.mubr.f32.gmra.mxu0 %v1039_v30 }
 0x286   : > { %v1746_v31 = vpop.f32.mrf.mxu1 }
 0x287   : > { %v1015_v32 = vadd.f32 %v1746_v31, %v1505_v56 }
 0x288   : > { %v1009_v33 = vpop.f32.mrf.mxu1 }
 0x289   : > { %v1010_v34 = vadd.f32 %v1505_v56, %v1009_v33  ;;  %v1041_v36 = vmax.f32 %v1015_v32, 0.0  ;;  %v1507_v32 = vld [vmem:[%s2358_s10] ss:$0 sm:$0xff] }
 0x28b   : > { %v1040_v35 = vmax.f32 %v1010_v34, 0.0 }
 0x28d   : > { %1800 = vmatprep.mubr.f32.mxu0 %v1040_v35 }
 0x28e   : > { %1801 = vmatmul.mubr.f32.gmra.mxu0 %v1041_v36 }
 0x290   : > { %v1749_v37 = vpop.f32.mrf.mxu1 }
 0x291   : > { %v1025_v38 = vadd.f32 %v1749_v37, %v1505_v56 }
 0x292   : > { %v1019_v39 = vpop.f32.mrf.mxu1 }
 0x293   : > { %v1020_v40 = vadd.f32 %v1505_v56, %v1019_v39  ;;  %v1043_v58 = vmax.f32 %v1025_v38, 0.0 }
 0x295   : > { %v1042_v42 = vmax.f32 %v1020_v40, 0.0 }
 0x297   : > { %1803 = vmatprep.mubr.f32.mxu0 %v1042_v42 }
 0x298   : > { %1804 = vmatmul.mubr.f32.gmra.mxu0 %v1043_v58 }
 0x315   : > { %v1784_v45 = vpop.f32.mrf.mxu0 }
 0x316   : > { %v1139_v46 = vadd.f32 %v1784_v45, %v1506_v44 }
 0x317   : > { %v1133_v47 = vpop.f32.mrf.mxu0 }
 0x318   : > { %v1134_v48 = vadd.f32 %v1506_v44, %v1133_v47  ;;  %v1213_v51 = vmax.f32 %v1139_v46, 0.0 }
 0x31a   : > { %v1212_v49 = vmax.f32 %v1134_v48, 0.0  ;;  %v1787_v50 = vpop.f32.mrf.mxu0 }
 0x31b   : > { %v1149_v52 = vadd.f32 %v1787_v50, %v1506_v44 }
 0x31c   : > { %v1143_v54 = vpop.f32.mrf.mxu0  ;;  %1838 = vmatprep.mubr.f32.mxu1 %v1212_v49 }
 0x31d   : > { %v1144_v55 = vadd.f32 %v1506_v44, %v1143_v54  ;;  %1839 = vmatmul.mubr.f32.vlgmr.msra.gmra.mxu1 %v1213_v51  ;;  %v1215_v60 = vmax.f32 %v1149_v52, 0.0 }
 0x31e   : > { %v1790_v56 = vpop.f32.mrf.mxu0 }
 0x31f   : > { %v1214_v59 = vmax.f32 %v1144_v55, 0.0  ;;  %v1159_v61 = vadd.f32 %v1790_v56, %v1506_v44 }
 0x320   : > { %v1153_v63 = vpop.f32.mrf.mxu0 }
 0x321   : > { %v1154_v0 = vadd.f32 %v1506_v44, %v1153_v63  ;;  %1841 = vmatprep.mubr.f32.mxu1 %v1214_v59  ;;  %v1217_v2 = vmax.f32 %v1159_v61, 0.0 }
 0x322   : > { %1842 = vmatmul.mubr.f32.gmra.mxu1 %v1215_v60 }
 0x323   : > { %v1216_v1 = vmax.f32 %v1154_v0, 0.0 }
 0x325   : > { %1844 = vmatprep.mubr.f32.mxu1 %v1216_v1 }
 0x326   : > { %1845 = vmatmul.mubr.f32.gmra.mxu1 %v1217_v2 }
 0x328   : > { %v1793_v3 = vpop.f32.mrf.mxu0 }
 0x329   : > { %v1169_v4 = vadd.f32 %v1793_v3, %v1506_v44 }
 0x32a   : > { %v1163_v5 = vpop.f32.mrf.mxu0 }
 0x32b   : > { %v1164_v6 = vadd.f32 %v1506_v44, %v1163_v5  ;;  %v1219_v8 = vmax.f32 %v1169_v4, 0.0 }
 0x32d   : > { %v1218_v7 = vmax.f32 %v1164_v6, 0.0 }
 0x32f   : > { %1847 = vmatprep.mubr.f32.mxu1 %v1218_v7 }
 0x330   : > { %1848 = vmatmul.mubr.f32.gmra.mxu1 %v1219_v8 }
 0x336   : > { %v1796_v9 = vpop.f32.mrf.mxu0 }
 0x337   : > { %v1179_v10 = vadd.f32 %v1796_v9, %v1506_v44 }
 0x338   : > { %v1173_v53 = vpop.f32.mrf.mxu0 }
 0x339   : > { %v1174_v11 = vadd.f32 %v1506_v44, %v1173_v53  ;;  %v1221_v13 = vmax.f32 %v1179_v10, 0.0 }
 0x33b   : > { %v1220_v12 = vmax.f32 %v1174_v11, 0.0 }
 0x33d   : > { %1850 = vmatprep.mubr.f32.mxu1 %v1220_v12 }
 0x33e   : > { %1851 = vmatmul.mubr.f32.gmra.mxu1 %v1221_v13 }
 0x340   : > { %v1799_v14 = vpop.f32.mrf.mxu0 }
 0x341   : > { %v1189_v15 = vadd.f32 %v1799_v14, %v1506_v44 }
 0x342   : > { %v1183_v16 = vpop.f32.mrf.mxu0 }
 0x343   : > { %v1184_v17 = vadd.f32 %v1506_v44, %v1183_v16  ;;  %v1223_v19 = vmax.f32 %v1189_v15, 0.0 }
 0x345   : > { %v1222_v18 = vmax.f32 %v1184_v17, 0.0 }
 0x347   : > { %1853 = vmatprep.mubr.f32.mxu1 %v1222_v18 }
 0x348   : > { %1854 = vmatmul.mubr.f32.gmra.mxu1 %v1223_v19 }
 0x34e   : > { %v1802_v20 = vpop.f32.mrf.mxu0 }
 0x34f   : > { %v1199_v21 = vadd.f32 %v1802_v20, %v1506_v44 }
 0x350   : > { %v1193_v22 = vpop.f32.mrf.mxu0 }
 0x351   : > { %v1194_v23 = vadd.f32 %v1506_v44, %v1193_v22  ;;  %v1225_v25 = vmax.f32 %v1199_v21, 0.0 }
 0x353   : > { %v1224_v24 = vmax.f32 %v1194_v23, 0.0 }
 0x355   : > { %1856 = vmatprep.mubr.f32.mxu1 %v1224_v24 }
 0x356   : > { %1857 = vmatmul.mubr.f32.gmra.mxu1 %v1225_v25 }
 0x358   : > { %v1805_v26 = vpop.f32.mrf.mxu0 }
 0x359   : > { %v1209_v27 = vadd.f32 %v1805_v26, %v1506_v44 }
 0x35a   : > { %v1203_v28 = vpop.f32.mrf.mxu0 }
 0x35b   : > { %v1204_v29 = vadd.f32 %v1506_v44, %v1203_v28  ;;  %v1227_v31 = vmax.f32 %v1209_v27, 0.0 }
 0x35d   : > { %v1226_v30 = vmax.f32 %v1204_v29, 0.0 }
 0x35f   : > { %1859 = vmatprep.mubr.f32.mxu1 %v1226_v30 }
 0x360   : > { %1860 = vmatmul.mubr.f32.gmra.mxu1 %v1227_v31 }
 0x3dd   : > { %v1840_v33 = vpop.f32.mrf.mxu1 }
 0x3de   : > { %v1323_v34 = vadd.f32 %v1840_v33, %v1507_v32 }
 0x3df   : > { %v1317_v35 = vpop.f32.mrf.mxu1 }
 0x3e0   : > { %1397 = vst [vmem:[%s2327_s18 + $0x8] sm:$0xff] %v1323_v34  ;;  %v1318_v36 = vadd.f32 %v1507_v32, %v1317_v35 }
 0x3e2   : > { %1396 = vst [vmem:[%s2327_s18] sm:$0xff] %v1318_v36  ;;  %v1843_v37 = vpop.f32.mrf.mxu1 }
 0x3e3   : > { %v1333_v38 = vadd.f32 %v1843_v37, %v1507_v32 }
 0x3e4   : > { %v1327_v39 = vpop.f32.mrf.mxu1 }
 0x3e5   : > { %1399 = vst [vmem:[%s2327_s18 + $0x18] sm:$0xff] %v1333_v38  ;;  %v1328_v40 = vadd.f32 %v1507_v32, %v1327_v39 }
 0x3e6   : > { %v1846_v41 = vpop.f32.mrf.mxu1 }
 0x3e7   : > { %1398 = vst [vmem:[%s2327_s18 + $0x10] sm:$0xff] %v1328_v40  ;;  %v1343_v42 = vadd.f32 %v1846_v41, %v1507_v32 }
 0x3e8   : > { %v1337_v58 = vpop.f32.mrf.mxu1 }
 0x3e9   : > { %1401 = vst [vmem:[%s2327_s18 + $0x28] sm:$0xff] %v1343_v42  ;;  %v1338_v57 = vadd.f32 %v1507_v32, %v1337_v58 }
 0x3eb   : > { %1400 = vst [vmem:[%s2327_s18 + $0x20] sm:$0xff] %v1338_v57 }
 0x3f0   : > { %v1849_v62 = vpop.f32.mrf.mxu1 }
 0x3f1   : > { %v1353_v43 = vadd.f32 %v1849_v62, %v1507_v32 }
 0x3f2   : > { %v1347_v44 = vpop.f32.mrf.mxu1 }
 0x3f3   : > { %1403 = vst [vmem:[%s2327_s18 + $0x38] sm:$0xff] %v1353_v43  ;;  %v1348_v45 = vadd.f32 %v1507_v32, %v1347_v44 }
 0x3f5   : > { %1402 = vst [vmem:[%s2327_s18 + $0x30] sm:$0xff] %v1348_v45 }
 0x3fe   : > { %v1852_v46 = vpop.f32.mrf.mxu1 }
 0x3ff   : > { %v1363_v47 = vadd.f32 %v1852_v46, %v1507_v32 }
 0x400   : > { %v1357_v48 = vpop.f32.mrf.mxu1 }
 0x401   : > { %1405 = vst [vmem:[%s2327_s18 + $0x48] sm:$0xff] %v1363_v47  ;;  %v1358_v49 = vadd.f32 %v1507_v32, %v1357_v48 }
 0x403   : > { %1404 = vst [vmem:[%s2327_s18 + $0x40] sm:$0xff] %v1358_v49 }
 0x408   : > { %v1855_v50 = vpop.f32.mrf.mxu1 }
 0x409   : > { %v1373_v51 = vadd.f32 %v1855_v50, %v1507_v32 }
 0x40a   : > { %v1367_v52 = vpop.f32.mrf.mxu1 }
 0x40b   : > { %1407 = vst [vmem:[%s2327_s18 + $0x58] sm:$0xff] %v1373_v51  ;;  %v1368_v54 = vadd.f32 %v1507_v32, %v1367_v52 }
 0x40d   : > { %1406 = vst [vmem:[%s2327_s18 + $0x50] sm:$0xff] %v1368_v54 }
 0x416   : > { %v1858_v55 = vpop.f32.mrf.mxu1 }
 0x417   : > { %v1383_v56 = vadd.f32 %v1858_v55, %v1507_v32 }
 0x418   : > { %v1377_v59 = vpop.f32.mrf.mxu1 }
 0x419   : > { %1409 = vst [vmem:[%s2327_s18 + $0x68] sm:$0xff] %v1383_v56  ;;  %v1378_v60 = vadd.f32 %v1507_v32, %v1377_v59 }
 0x41b   : > { %1408 = vst [vmem:[%s2327_s18 + $0x60] sm:$0xff] %v1378_v60 }
 0x420   : > { %v1861_v61 = vpop.f32.mrf.mxu1 }
 0x421   : > { %v1393_v63 = vadd.f32 %v1861_v61, %v1507_v32 }
 0x422   : > { %v1387_v0 = vpop.f32.mrf.mxu1 }
 0x423   : > { %1411 = vst [vmem:[%s2327_s18 + $0x78] sm:$0xff] %v1393_v63  ;;  %v1388_v1 = vadd.f32 %v1507_v32, %v1387_v0 }
 0x425   : > { %1410 = vst [vmem:[%s2327_s18 + $0x70] sm:$0xff] %v1388_v1 }
 0x426 PF: > { %s23_s17 = sadd.s32 1, %s1979_s17  }
 0x427   : > { %p20_p3 = scmp.ge.s32.totalorder %s23_s17, 4  }
 0x429   :  { %22 = sbr.rel (!%p20_p3) target bundleno = 2 (0x2), region = 103 }
 0x42e   :  { %1434 = vsyncpa [#allocation3], 1 }
 0x42f   :  { %1436 = vsyncpa [#allocation3 + $0x1], 1 }
 0x430   :  { %1437 = vsyncpa [#allocation5], 1 }

</bundles_post_ra>
